<compile_context>
chip_gen: v7x
topology: tpu7x:2x2x1
jax: 0.10.0
libtpu: 0.0.40
codegen_flags: <defaults>
</compile_context>

<pallas_src>
import numpy as np
import jax
import jax.numpy as jnp
from jax.experimental import pallas as pl
from jax.experimental.pallas import tpu as pltpu


def _round_up(x, m):
    return ((x + m - 1) // m) * m


def _round_down(x, m):
    return (x // m) * m


def _largest_divisor_leq(n, cap):
    cap = max(1, min(n, cap))
    for d in range(cap, 0, -1):
        if n % d == 0:
            return d
    return 1


def _vmem_capacity_bytes():
    try:
        return int(pltpu.get_tpu_info().vmem_capacity_bytes)
    except Exception:
        return 64 * 1024 * 1024  # conservative fallback (v7x per-TC VMEM)


# --------------------------------------------------------------------------
# Kernels
# --------------------------------------------------------------------------
def _make_gcn_kernel_2d(n_nodes, tk, needs_k_mask):
    """BT == 1 path: batch dim squeezed, plain 2-D MXU matmuls.

    Refs: adj (TN, TK), x (TK, C_in), w (C_in, C_out), o (TN, C_out),
          acc (TN, C_in) f32 scratch accumulator (resident across K tiles).
    """

    def kernel(adj_ref, x_ref, w_ref, o_ref, acc_ref):
        k = pl.program_id(2)

        @pl.when(k == 0)
        def _init():
            acc_ref[...] = jnp.zeros_like(acc_ref)

        adj = adj_ref[...]
        x = x_ref[...]
        if needs_k_mask:
            # Ragged last K tile: out-of-bounds block contents are undefined,
            # so zero both the adj columns and the matching x rows past N
            # before they enter the reduction.
            k_start = k * tk
            col = jax.lax.broadcasted_iota(jnp.int32, adj.shape, 1) + k_start
            adj = jnp.where(col < n_nodes, adj, jnp.zeros_like(adj))
            row = jax.lax.broadcasted_iota(jnp.int32, x.shape, 0) + k_start
            x = jnp.where(row < n_nodes, x, jnp.zeros_like(x))

        acc_ref[...] += jnp.dot(adj, x, preferred_element_type=jnp.float32)

        @pl.when(k == pl.num_programs(2) - 1)
        def _finalize():
            out = jnp.dot(acc_ref[...], w_ref[...].astype(jnp.float32),
                          preferred_element_type=jnp.float32)
            o_ref[...] = out.astype(o_ref.dtype)

    return kernel


def _gcn_kernel_3d(adj_ref, x_ref, w_ref, o_ref, acc_ref):
    """BT > 1 path (small-graph regime only: TN == TK == N, no ragged tiles).

    Refs: adj (BT, TN, TK), x (BT, TK, C_in), w (C_in, C_out),
          o (BT, TN, C_out), acc (BT, TN, C_in) f32 scratch.
    """
    k = pl.program_id(2)

    @pl.when(k == 0)
    def _init():
        acc_ref[...] = jnp.zeros_like(acc_ref)

    acc_ref[...] += jnp.einsum(
        "bnk,bkc->bnc", adj_ref[...], x_ref[...],
        preferred_element_type=jnp.float32)

    @pl.when(k == pl.num_programs(2) - 1)
    def _finalize():
        bt, tn, c_in = acc_ref.shape
        c_out = w_ref.shape[-1]
        # Single 2-D matmul: merging the leading dims is layout-free (the lane
        # dim C_in is unchanged) and avoids BT copies of W / BT tiny matmuls.
        out = jnp.dot(acc_ref[...].reshape(bt * tn, c_in),
                      w_ref[...].astype(jnp.float32),
                      preferred_element_type=jnp.float32)
        o_ref[...] = out.reshape(bt, tn, c_out).astype(o_ref.dtype)


# --------------------------------------------------------------------------
# Wrapper
# --------------------------------------------------------------------------
def gcn_forward(node_feats, adj_matrix, weight_t, node_type=None):
    """GCN forward.

    node_feats : (B, N, C_in)
    adj_matrix : (B, N, N)   -- never cast here; if the caller stores it in
                               bf16 the kernel's HBM traffic is halved.
    weight_t   : (C_in, C_out)  -- transposed nn.Linear weight (so x @ W^T)
    node_type  : unused (signature parity with the PyTorch module)
    """
    del node_type  # unused by the PyTorch forward as well
    B, N, C_in = node_feats.shape
    C_out = weight_t.shape[1]
    out_dtype = node_feats.dtype

    # Bring the *small* operands to the adjacency's dtype (cheap); never touch
    # the adjacency itself — an extra cast pass over (B, N, N) would roughly
    # double the HBM traffic of this bandwidth-bound kernel.
    if node_feats.dtype != adj_matrix.dtype:
        node_feats = node_feats.astype(adj_matrix.dtype)
    if weight_t.dtype != adj_matrix.dtype:
        weight_t = weight_t.astype(adj_matrix.dtype)

    itemsize = jnp.dtype(adj_matrix.dtype).itemsize
    out_itemsize = jnp.dtype(out_dtype).itemsize
    lane = 128

    vmem_cap = _vmem_capacity_bytes()
    # Per-buffer adjacency tile budget (double-buffered by Pallas): large tiles
    # amortize the ~0.35 us per-grid-step overhead; 16 MiB keeps 2x tiles plus
    # the small x/out/acc blocks comfortably inside even v7x's 64 MiB VMEM.
    adj_tile_budget = min(16 * 1024 * 1024, vmem_cap // 4)

    # ---- tile / batch-block selection ---------------------------------------
    if N * N * itemsize <= adj_tile_budget:
        # Small-graph regime: whole (N, N) adjacency per batch element
        # (full-extent blocks need no (8,128) alignment and no masking).
        TN = TK = N
        needs_k_mask = False
        bt_cap_mem = max(1, adj_tile_budget // max(1, N * N * itemsize))
        bt_want = min(B, max(1, -(-512 // max(1, N))), bt_cap_mem)
        BT = _largest_divisor_leq(B, bt_want)
        # Keep at least 2 parallel blocks so both v7x TensorCores get work.
        if B >= 2 and B // BT < 2:
            BT = _largest_divisor_leq(B, max(1, B // 2))
    else:
        # Large-graph regime: tile the aggregation matmul; TK sized from the
        # byte budget so bf16 adjacencies automatically get 2x wider tiles.
        BT = 1
        TN = min(1024, _round_up(N, 8))
        TK = max(lane, _round_down(adj_tile_budget // (TN * itemsize), lane))
        TK = min(TK, _round_up(N, lane))
        needs_k_mask = (N % TK) != 0

    assert BT == 1 or not needs_k_mask  # masking only needed on the 2-D path

    grid = (B // BT, pl.cdiv(N, TN), pl.cdiv(N, TK))

    if BT == 1:
        kernel = _make_gcn_kernel_2d(N, TK, needs_k_mask)
        in_specs = [
            pl.BlockSpec((pl.Squeezed(), TN, TK), lambda b, i, k: (b, i, k)),
            pl.BlockSpec((pl.Squeezed(), TK, C_in), lambda b, i, k: (b, k, 0)),
            pl.BlockSpec((C_in, C_out), lambda b, i, k: (0, 0)),
        ]
        out_specs = pl.BlockSpec((pl.Squeezed(), TN, C_out),
                                 lambda b, i, k: (b, i, 0))
        scratch = [pltpu.VMEM((TN, C_in), jnp.float32)]
    else:
        kernel = _gcn_kernel_3d
        in_specs = [
            pl.BlockSpec((BT, TN, TK), lambda b, i, k: (b, i, k)),
            pl.BlockSpec((BT, TK, C_in), lambda b, i, k: (b, k, 0)),
            pl.BlockSpec((C_in, C_out), lambda b, i, k: (0, 0)),
        ]
        out_specs = pl.BlockSpec((BT, TN, C_out), lambda b, i, k: (b, i, 0))
        scratch = [pltpu.VMEM((BT, TN, C_in), jnp.float32)]

    # ---- VMEM accounting: double-buffered in/out blocks + scratch, with lane
    # padding of narrow feature dims.  No extra safety factor on top.
    adj_blk = BT * max(TN, 8) * max(TK, lane) * itemsize
    x_blk = BT * max(TK, 8) * max(C_in, lane) * itemsize
    w_blk = max(C_in, 8) * max(C_out, lane) * itemsize
    out_blk = BT * max(TN, 8) * max(C_out, lane) * out_itemsize
    acc_blk = BT * max(TN, 8) * max(C_in, lane) * 4
    vmem_est = 2 * (adj_blk + x_blk + w_blk + out_blk) + acc_blk
    vmem_limit = int(min(int(0.85 * vmem_cap),
                         max(32 * 1024 * 1024, vmem_est + 4 * 1024 * 1024)))

    grid_spec = pltpu.PrefetchScalarGridSpec(
        num_scalar_prefetch=0,
        grid=grid,
        in_specs=in_specs,
        out_specs=out_specs,
        scratch_shapes=scratch,
    )

    return pl.pallas_call(
        kernel,
        out_shape=jax.ShapeDtypeStruct((B, N, C_out), out_dtype),
        grid_spec=grid_spec,
        compiler_params=pltpu.CompilerParams(
            dimension_semantics=("parallel", "parallel", "arbitrary"),
            vmem_limit_bytes=vmem_limit,
        ),
    )(adj_matrix, node_feats, weight_t)


def gcn_reference(node_feats, adj_matrix, weight_t):
    h = jnp.einsum("bij,bjc->bic", adj_matrix, node_feats)
    return jnp.einsum("bic,co->bio", h, weight_t)


if __name__ == "__main__":
    C_IN, C_OUT = 8, 32   # feature dims
    NUM_TYPES = 4         # unused in forward (parity with __init__)

    key = jax.random.PRNGKey(0)
    k_x, k_adj, k_w, k_t = jax.random.split(key, 4)

    # Deterministic init matching nn.init.uniform_(-sqrt(6/(c_in+c_out)), +...)
    bound = float(np.sqrt(6.0 / (C_IN + C_OUT)))
    weight = jax.random.uniform(
        k_w, (C_OUT, C_IN), minval=-bound, maxval=bound, dtype=jnp.float32
    )
    weight_t = weight.T  # (C_in, C_out) so the kernel computes x @ W^T

    def make_inputs(B, N):
        node_feats = jax.random.normal(k_x, (B, N, C_IN), dtype=jnp.float32)
        adj_raw = jax.random.uniform(k_adj, (B, N, N), dtype=jnp.float32)
        adj_matrix = adj_raw / jnp.sum(adj_raw, axis=-1, keepdims=True)
        node_type = jax.random.randint(k_t, (B, N), 0, NUM_TYPES)
        return node_feats, adj_matrix, node_type

    # ---- config 1: B=2, N=16 (BT==1 squeezed path) --------------------------
    node_feats, adj_matrix, node_type = make_inputs(2, 16)
    ref = gcn_reference(node_feats, adj_matrix, weight_t)

    out = gcn_forward(node_feats, adj_matrix, weight_t, node_type)
    out = jax.block_until_ready(out)
    np.testing.assert_allclose(np.asarray(out), np.asarray(ref),
                               rtol=1e-5, atol=1e-5)

    # bf16 adjacency supplied by the caller (halves adj HBM traffic; f32 acc).
    out_bf16 = gcn_forward(node_feats, adj_matrix.astype(jnp.bfloat16),
                           weight_t, node_type)
    out_bf16 = jax.block_until_ready(out_bf16)
    np.testing.assert_allclose(np.asarray(out_bf16), np.asarray(ref),
                               rtol=3e-2, atol=3e-2)

    # ---- config 2: B=4, N=16 (BT>1 batched path) -----------------------------
    node_feats4, adj_matrix4, node_type4 = make_inputs(4, 16)
    ref4 = gcn_reference(node_feats4, adj_matrix4, weight_t)
    out4 = gcn_forward(node_feats4, adj_matrix4, weight_t, node_type4)
    out4 = jax.block_until_ready(out4)
    np.testing.assert_allclose(np.asarray(out4), np.asarray(ref4),
                               rtol=1e-5, atol=1e-5)

    print("KERNEL_OK")
</pallas_src>

<mosaic_0001>
module attributes {stable_mosaic.version = 11 : i64} {
  func.func @kernel(%arg0: i32, %arg1: i32, %arg2: i32, %arg3: memref<1x16x16xf32, #tpu.memory_space<vmem>>, %arg4: memref<1x16x8xf32, #tpu.memory_space<vmem>>, %arg5: memref<8x32xf32, #tpu.memory_space<vmem>>, %arg6: memref<1x16x32xf32, #tpu.memory_space<vmem>>, %arg7: memref<16x8xf32, #tpu.memory_space<vmem>>) attributes {dimension_semantics = [#tpu.dimension_semantics<parallel>, #tpu.dimension_semantics<parallel>, #tpu.dimension_semantics<arbitrary>], iteration_bounds = array<i64: 2, 1, 1>, scalar_prefetch = 0 : i64, scratch_operands = 1 : i64, tpu.core_type = #tpu.core_type<tc>, window_params = [{transform_indices = @transform_0, window_bounds = array<i64: 1, 16, 16>}, {transform_indices = @transform_1, window_bounds = array<i64: 1, 16, 8>}, {pipeline_mode = #tpu.pipeline_mode<synchronous>, transform_indices = @transform_2, window_bounds = array<i64: 8, 32>}, {transform_indices = @transform_3, window_bounds = array<i64: 1, 16, 32>}]} {
    %c0_i32 = arith.constant 0 : i32
    %0 = arith.cmpi eq, %arg2, %c0_i32 : i32
    %1 = arith.extui %0 : i1 to i32
    %c0_i32_0 = arith.constant 0 : i32
    %2 = arith.cmpi ne, %1, %c0_i32_0 : i32
    scf.if %2 {
      %cst_12 = arith.constant 0.000000e+00 : f32
      %14 = vector.broadcast %cst_12 : f32 to vector<16x8xf32>
      %c0_13 = arith.constant 0 : index
      %c0_14 = arith.constant 0 : index
      %15 = vector.load %arg7[%c0_13, %c0_14] : memref<16x8xf32, #tpu.memory_space<vmem>>, vector<16x8xf32>
      tpu.vector_store %arg7[%c0_13, %c0_14], %14 {strides = array<i32>} : memref<16x8xf32, #tpu.memory_space<vmem>>, vector<16x8xf32>,
    } else {
    }
    %c0 = arith.constant 0 : index
    %c0_1 = arith.constant 0 : index
    %c0_2 = arith.constant 0 : index
    %3 = vector.load %arg3[%c0, %c0_1, %c0_2] : memref<1x16x16xf32, #tpu.memory_space<vmem>>, vector<1x16x16xf32>
    %4 = vector.shape_cast %3 : vector<1x16x16xf32> to vector<16x16xf32>
    %c0_3 = arith.constant 0 : index
    %c0_4 = arith.constant 0 : index
    %c0_5 = arith.constant 0 : index
    %5 = vector.load %arg4[%c0_3, %c0_4, %c0_5] : memref<1x16x8xf32, #tpu.memory_space<vmem>>, vector<1x16x8xf32>
    %6 = vector.shape_cast %5 : vector<1x16x8xf32> to vector<16x8xf32>
    %c0_6 = arith.constant 0 : index
    %c0_7 = arith.constant 0 : index
    %7 = vector.load %arg7[%c0_6, %c0_7] : memref<16x8xf32, #tpu.memory_space<vmem>>, vector<16x8xf32>
    %cst = arith.constant dense<0.000000e+00> : vector<16x8xf32>
    %8 = tpu.matmul %4, %6, %cst {dimension_numbers = #tpu.dot_dimension_numbers<[1], [0], [0], [1], [0, 0, 1, 1], [], []>} : vector<16x16xf32>, vector<16x8xf32>, vector<16x8xf32> -> vector<16x8xf32>
    %9 = arith.addf %7, %8 : vector<16x8xf32>
    %c0_8 = arith.constant 0 : index
    %c0_9 = arith.constant 0 : index
    %10 = vector.load %arg7[%c0_8, %c0_9] : memref<16x8xf32, #tpu.memory_space<vmem>>, vector<16x8xf32>
    tpu.vector_store %arg7[%c0_8, %c0_9], %9 {strides = array<i32>} : memref<16x8xf32, #tpu.memory_space<vmem>>, vector<16x8xf32>,
    %c0_i32_10 = arith.constant 0 : i32
    %11 = arith.cmpi eq, %arg2, %c0_i32_10 : i32
    %12 = arith.extui %11 : i1 to i32
    %c0_i32_11 = arith.constant 0 : i32
    %13 = arith.cmpi ne, %12, %c0_i32_11 : i32
    scf.if %13 {
      %c0_12 = arith.constant 0 : index
      %c0_13 = arith.constant 0 : index
      %14 = vector.load %arg7[%c0_12, %c0_13] : memref<16x8xf32, #tpu.memory_space<vmem>>, vector<16x8xf32>
      %c0_14 = arith.constant 0 : index
      %c0_15 = arith.constant 0 : index
      %15 = vector.load %arg5[%c0_14, %c0_15] : memref<8x32xf32, #tpu.memory_space<vmem>>, vector<8x32xf32>
      %cst_16 = arith.constant dense<0.000000e+00> : vector<16x32xf32>
      %16 = tpu.matmul %14, %15, %cst_16 {dimension_numbers = #tpu.dot_dimension_numbers<[1], [0], [0], [1], [0, 0, 1, 1], [], []>} : vector<16x8xf32>, vector<8x32xf32>, vector<16x32xf32> -> vector<16x32xf32>
      %c0_17 = arith.constant 0 : index
      %c0_18 = arith.constant 0 : index
      %c0_19 = arith.constant 0 : index
      %17 = vector.load %arg6[%c0_17, %c0_18, %c0_19] : memref<1x16x32xf32, #tpu.memory_space<vmem>>, vector<1x16x32xf32>
      %18 = vector.shape_cast %17 : vector<1x16x32xf32> to vector<16x32xf32>
      %19 = vector.shape_cast %16 : vector<16x32xf32> to vector<1x16x32xf32>
      tpu.vector_store %arg6[%c0_17, %c0_18, %c0_19], %19 {strides = array<i32>} : memref<1x16x32xf32, #tpu.memory_space<vmem>>, vector<1x16x32xf32>,
    } else {
    }
    return
  }
  func.func @transform_0(%arg0: i32, %arg1: i32, %arg2: i32) -> (i32, i32, i32) {
    %c0_i32 = arith.constant 0 : i32
    return %arg0, %arg1, %arg2 : i32, i32, i32
  }
  func.func @transform_1(%arg0: i32, %arg1: i32, %arg2: i32) -> (i32, i32, i32) {
    %c0_i32 = arith.constant 0 : i32
    %c0_i32_0 = arith.constant 0 : i32
    return %arg0, %arg2, %c0_i32 : i32, i32, i32
  }
  func.func @transform_2(%arg0: i32, %arg1: i32, %arg2: i32) -> (i32, i32) {
    %c0_i32 = arith.constant 0 : i32
    %c0_i32_0 = arith.constant 0 : i32
    %c0_i32_1 = arith.constant 0 : i32
    return %c0_i32, %c0_i32_0 : i32, i32
  }
  func.func @transform_3(%arg0: i32, %arg1: i32, %arg2: i32) -> (i32, i32, i32) {
    %c0_i32 = arith.constant 0 : i32
    %c0_i32_0 = arith.constant 0 : i32
    return %arg0, %arg1, %c0_i32 : i32, i32, i32
  }
}

</mosaic_0001>

<bundles_post_ra>
// kernel: tpu_custom_call.1
= control target key start
LH: loop header
LB: loop body
LE: loop exit
PB: predicated region body
PF: predicated region fallthrough
CT: control target
= control target key end

     0   :  { %8 = vsyncpa [#allocation4], 0  ;;  %s897_s0 = inlined_call_operand.vmem [shape: f32[2,16,16], index: 0, kind: input, shape index: {}]   ;;  %s898_s1 = inlined_call_operand.vmem [shape: f32[2,16,8], index: 1, kind: input, shape index: {}]   ;;  %s899_s2 = inlined_call_operand.vmem [shape: f32[8,32], index: 2, kind: input, shape index: {}]   ;;  %s900_s3 = inlined_call_operand.hbm [shape: f32[2,16,32], index: 3, kind: output, shape index: {}]  }
   0x1   :  { %10 = vsyncpa [#allocation4 + $0x1], 0  ;;  %s770_s12 = smov 0   ;;  %s772_s13 = smov 0  }
   0x2   :  { %s774_s14 = smov 0   ;;  %s776_s15 = smov 0  }
   0x3   :  { %s778_s16 = smov 0   ;;  %s780_s17 = smov 0  }
   0x4 LB: > { %s563_s18 = sadd.s32 4294967295, %s744_s17   ;;  %s564_s19 = sadd.s32 4294967294, %s744_s17   ;;  %s744_s17 = sphi %s780_s17, %s16_s17   ;;  %s740_s16 = sphi %s778_s16, %s907_s16   ;;  %s736_s15 = sphi %s776_s15, %s906_s15   ;;  %s732_s14 = sphi %s774_s14, %s905_s14   ;;  %s728_s13 = sphi %s772_s13, %s904_s13   ;;  %s724_s12 = sphi %s770_s12, %s903_s12  }
   0x5   : > { %s35_s20 = sadd.s32 1, %s740_s16  ;;  %s123_s21 = sadd.s32 1, %s732_s14 }
   0x6   : > { %p37_p0 = scmp.ge.s32.totalorder %s35_s20, 2  ;;  %p133_p1 = scmp.ne.s32.totalorder %s732_s14, %s728_s13 }
   0x7   : > { %p134_p2 = scmp.eq.s32.totalorder %s563_s18, 1  ;;  %p139_p3 = scmp.ne.s32.totalorder %s728_s13, %s724_s12 }
   0x8   : > { %s909_s20 = smov (%p37_p0, %s35_s20), 0  ;;  %p140_p5 = scmp.eq.s32.totalorder %s564_s19, 1 }
   0x9   : > { %p810_p4 = por %p134_p2, %p133_p1  ;;  %s118_s23 = ssub.s32 %s740_s16, %s909_s20 }
   0xa   : > { %p567_p6 = scmp.ge.s32.totalorder %s744_s17, 1  ;;  %p121_p7 = scmp.eq.s32.totalorder %s118_s23, 0 }
   0xb   : > { %p817_p8 = por %p140_p5, %p139_p3  ;;  %p190_p9 = scmp.lt.s32.totalorder %s744_s17, 3 }
   0xc   : > { %s823_s25 = scalar_select %p121_p7, %s732_s14, %s123_s21  }
   0xd   : > { %p191_p10 = pnand %p567_p6, %p190_p9 }
   0xe   : > { %p231_p11 = scmp.lt.s32.totalorder (!%p191_p10), %s736_s15, 1  ;;  %vm258_vm0 = vcmask (!%p191_p10), 64512   ;;  %v746_v0 = vmov (!%p191_p10), 0.0   ;;  %vm267_vm1 = vcmask (!%p191_p10), 130048   ;;  %v359_v6 = vld [vmem:[%s899_s2] sm:$0xff] (!%p191_p10)  ;;  %s227_s9 = sand.u32 (!%p191_p10), 1, %s728_s13  }
   0xf   : > { %194 = sbr.rel (%p191_p10) target bundleno = 485 (0x1e5), region = 32  ;;  %260 = vst.msk [vmem:[#allocation2 + $0x8] sm:$0xff] (!%p191_p10), %vm258_vm0, %v746_v0  ;;  %259 = vst.msk [vmem:[#allocation2] sm:$0xff] (!%p191_p10), %vm258_vm0, %v746_v0  ;;  %599 = vmatprep.subr.mxu1 (!%p191_p10), %v359_v6  ;;  %s568_s10 = sshll.u32 (!%p191_p10), %s227_s9, 4  ;;  %vm441_vm2 = vcmask (!%p191_p10), 261120  }
  0x10   : > { %600 = vmatpush3.msra.mxu1 (!%p191_p10), %v359_v6  ;;  %s229_s11 = scalar_lea.vmem (!%p191_p10), [#allocation3], %s568_s10  ;;  %s584_s19 = sshll.u32 (!%p191_p10), %s736_s15, 8 }
  0x11   : > { %s460_s18 = sshll.u32 (!%p191_p10), %s229_s11, 4  ;;  %s844_s18 = int_to_ptr.vmem [resolvable:$true] %s460_s18 }
  0x12   : > { %s666_s28 = scalar_lea.vmem (!%p191_p10), %s844_s18, 256 }
  0x13   : > { %p667_p12 = scmp.ne.s32.totalorder (!%p191_p10), %s844_s18, %s666_s28 }
  0x15   : > { %p668_p13 = pnand (!%p191_p10), %p667_p12, %p810_p4 }
  0x16   : > { %s232_s26 = scalar_select %p231_p11, %s736_s15, 1  ;;  %v266_v7 = vld [vmem:[#allocation2 + $0x8] sm:$0xff]  ;;  %v265_v8 = vld [vmem:[#allocation2] sm:$0xff] }
  0x17   : > { %p669_p0 = pneg %p668_p13  ;;  %s747_s15 = smov [#allocation3]  }
  0x18   : > { %s582_s27 = sshll.u32 %s232_s26, 4  ;;  %s849_s26 = scalar_lea.hbm %s900_s3, %s584_s19 }
  0x19   : > { %s251_s30 = scalar_lea.vmem %s898_s1, %s582_s27  ;;  %s241_s6 = scalar_lea.vmem %s897_s0, %s582_s27 }
  0x1a   : > { %v263_v1 = vld [vmem:[%s251_s30] sm:$0xff]  ;;  %v264_v2 = vld [vmem:[%s251_s30 + $0x8] sm:$0xff]  ;;  %s851_s27 = scalar_lea.sflag [#allocation4], %s227_s9  ;;  %s670_s29 = sshll.u32 %s747_s15, 4  ;;  %s671_s29 = int_to_ptr.vmem [resolvable:$false] %s670_s29 }
  0x1b   : > { %v261_v3 = vld [vmem:[%s241_s6] sm:$0xff]  ;;  %v604_v4 = vpack.c.bf16 %v264_v2, %v263_v1  ;;  %v262_v5 = vld [vmem:[%s241_s6 + $0x8] sm:$0xff]  ;;  %s672_s30 = scalar_lea.vmem %s671_s29, 512  ;;  %p673_p1 = scmp.lt.s32.totalorder %s844_s18, %s671_s29 }
  0x1c   : > { %596 = vmatprep.mubr.msk.f32.mxu0 %vm267_vm1, %v261_v3  ;;  %p674_p2 = scmp.lt.s32.totalorder %s672_s30, %s666_s28 }
  0x1d   : > { %605 = vmatprep.subr.bf16.mxu0 %v604_v4 }
  0x1e   : > { %607 = vmatpush3.bf16.msra.mxu0 %v604_v4  ;;  %p675_p3 = por %p674_p2, %p673_p1 }
  0x20   : > { %p676_p5 = pnand %p675_p3, %p669_p0 }
  0x21   : > { %597 = vmatmul.mubr.msk.f32.vlgmr.msra.gmra.mrb[0].mxu0 %vm267_vm1, %v262_v5 }
  0xf4   : > { %v598_v9 = vpop.f32.mrb[0].mxu0 }
  0xf5   : > { %v350_v10 = vadd.f32 %v598_v9, %v266_v7  ;;  %v340_v11 = vpop.f32.mrb[1].mxu0 }
  0xf6   : > { %v349_v12 = vadd.f32 %v340_v11, %v265_v8 }
  0xf7   : > { %353 = vst.msk [vmem:[#allocation2 + $0x8] sm:$0xff] %vm258_vm0, %v350_v10 }
  0xf8   : > { %352 = vst.msk [vmem:[#allocation2] sm:$0xff] %vm258_vm0, %v349_v12 }
  0xfe   : > { %v358_v14 = vld [vmem:[#allocation2 + $0x8] sm:$0xff] }
  0xff   : > { %v357_v13 = vld [vmem:[#allocation2] sm:$0xff] }
 0x100   : > { %601 = vmatprep.mubr.msk.f32.mxu1 %vm258_vm0, %v357_v13 }
 0x101   : > { %602 = vmatmul.mubr.msk.f32.vlgmr.msra.gmra.mrb[0].mxu1 %vm258_vm0, %v358_v14 }
 0x1d4   : > { %v603_v15 = vpop.f32.mrb[0].mxu1 }
 0x1d5   : > { %443 = vst.msk [vmem:[%s229_s11 + $0x8] sm:$0xff] %vm441_vm2, %v603_v15  ;;  %v432_v16 = vpop.f32.mrb[1].mxu1 }
 0x1d6   : > { %442 = vst.msk [vmem:[%s229_s11] sm:$0xff] %vm441_vm2, %v432_v16 }
 0x1d7   : > { %679 = shalt.err (!%p676_p5)
}
 0x1d8   : > { %s680_s4 = scalar_lea.hbm %s849_s26, 256  ;;  %s684_s7 = scalar_lea.hbm %s900_s3, 512 }
 0x1d9   : > { %p681_p6 = scmp.ne.s32.totalorder %s849_s26, %s680_s4  ;;  %p685_p10 = scmp.lt.u32.totalorder %s849_s26, %s900_s3 }
 0x1da   : > { %p686_p11 = scmp.lt.u32.totalorder %s684_s7, %s680_s4  ;;  %p688_p13 = scmp.lt.u32.totalorder %s680_s4, %s849_s26 }
 0x1db   : > { %p682_p7 = pnand %p681_p6, %p810_p4 }
 0x1dc   : > { %p687_p12 = por %p686_p11, %p685_p10 }
 0x1dd   : > { %p683_p9 = pneg %p682_p7 }
 0x1de   : > { %p689_p0 = por %p688_p13, %p687_p12 }
 0x1e0   : > { %p690_p1 = pnand %p689_p0, %p683_p9 }
 0x1e2   : > { %693 = shalt.err (!%p690_p1)
}
 0x1e3   : > { %s748_s10 = smov 128   ;;  %s749_s11 = smov 8  }
 0x1e4   : > { %608 = dma.vmem_to_hbm [thread:$0]  (%p810_p4), %s844_s18, 256, %s849_s26, %s851_s27, %s748_s10, %s748_s10, %s749_s11  }
 0x1e5 PF: > { %p614_p2 = scmp.ge.s32.totalorder %s744_s17, 2  ;;  %s475_s19 = sand.u32 1, %s724_s12  }
 0x1e6   : > { %s476_s21 = scalar_lea.sflag [#allocation4], %s475_s19 }
 0x1e7   : > { %p611_p3 = pnand %p614_p2, %p817_p8 }
 0x1e9   : > { %719 = dma.done.wait (!%p611_p3), %s476_s21, 256  }
 0x1ea   : > { %721 = vsyncadd (!%p611_p3), %s476_s21, 4294967040  ;;  %s16_s17 = sadd.s32 1, %s744_s17   ;;  %s903_s12 = smov %s728_s13 }
 0x1eb   : > { %p13_p5 = scmp.ge.s32.totalorder %s16_s17, 4   ;;  %s904_s13 = smov %s732_s14 }
 0x1ec   : > { %s905_s14 = smov %s823_s25  ;;  %s906_s15 = smov %s740_s16 }
 0x1ed   : > { %s907_s16 = smov %s909_s20  ;;  %15 = sbr.rel (!%p13_p5) target bundleno = 4 (0x4), region = 78 }
 0x1f4   :  { %481 = vsyncpa [#allocation4], 1 }
 0x1f5   :  { %483 = vsyncpa [#allocation4 + $0x1], 1 }

</bundles_post_ra>
